<compile_context>
chip_gen: v7x
topology: tpu7x:2x2x1
jax: 0.10.0
libtpu: 0.0.40
codegen_flags: <defaults>
</compile_context>

<pallas_src>
import functools

import jax
import jax.numpy as jnp
from jax import lax
from jax.experimental import pallas as pl
from jax.experimental.pallas import tpu as pltpu


# --------------------------------------------------------------------------- #
# Kernel A: GCN projection + adjacency aggregation + PReLU + avg readout
# --------------------------------------------------------------------------- #
def _cola_embed_kernel(bf_ref, ba_ref, wg_ref, bg_ref, wbil_ref, prelu_ref,
                       c_ref, hw_ref):
    # bf_ref : (S1, B_BLK, F)  bf16  node-major padded subgraph features
    # ba_ref : (S1, B_BLK, S1) f32   node-major padded adjacency (row = target)
    # wg_ref : (F, H) bf16, bg_ref: (1, H) f32, wbil_ref: (H, H) f32
    # prelu_ref: (1, 1) f32 PReLU slope
    s1, blk, f = bf_ref.shape
    wg = wg_ref[...]
    bg = bg_ref[...]                      # (1, H)
    wbil = wbil_ref[...]                  # (H, H)
    a = prelu_ref[...]                    # (1, 1), broadcasts on the VPU

    # GCN projection for every node in one MXU matmul (single weight push):
    # (S1*B_BLK, F) @ (F, H), f32 accumulation.  B_BLK is a multiple of 16 so
    # collapsing the leading dim is a pure relabel of the bf16 tiled layout.
    bf2 = bf_ref[...].reshape(s1 * blk, f)
    sf_all = jnp.dot(bf2, wg, preferred_element_type=jnp.float32)
    sf = [sf_all[n * blk:(n + 1) * blk, :] for n in range(s1)]   # (B_BLK, H)

    # Tiny (S1-wide) adjacency aggregation on the VPU, fused with the bias,
    # PReLU and the 'avg' readout -- no slicing of a (B, S1, H) intermediate.
    c_acc = None
    h_mv = None
    for n in range(s1):
        an = ba_ref[n]                                    # (B_BLK, S1)
        acc = an[:, 0:1] * sf[0]
        for m in range(1, s1):
            acc = acc + an[:, m:m + 1] * sf[m]
        h_n = acc + bg
        h_n = jnp.where(h_n > 0, h_n, a * h_n)            # PReLU (single slope)
        if n < s1 - 1:
            c_acc = h_n if c_acc is None else c_acc + h_n
        else:
            h_mv = h_n                                    # target-node embedding

    c_ref[...] = c_acc * (1.0 / (s1 - 1))                 # 'avg' readout
    hw_ref[...] = jnp.dot(h_mv, wbil,                     # pre-apply bilinear W
                          preferred_element_type=jnp.float32)


def cola_embed(bf_t, ba_t, wg, bg, wbil, prelu_a, *, block_b):
    s1, bp, f = bf_t.shape
    h = wg.shape[1]
    grid = (bp // block_b,)
    return pl.pallas_call(
        _cola_embed_kernel,
        out_shape=(jax.ShapeDtypeStruct((bp, h), jnp.float32),
                   jax.ShapeDtypeStruct((bp, h), jnp.float32)),
        grid=grid,
        in_specs=[
            pl.BlockSpec((s1, block_b, f), lambda i: (0, i, 0)),
            pl.BlockSpec((s1, block_b, s1), lambda i: (0, i, 0)),
            pl.BlockSpec((f, h), lambda i: (0, 0)),
            pl.BlockSpec((1, h), lambda i: (0, 0)),
            pl.BlockSpec((h, h), lambda i: (0, 0)),
            pl.BlockSpec((1, 1), lambda i: (0, 0)),
        ],
        out_specs=(
            pl.BlockSpec((block_b, h), lambda i: (i, 0)),
            pl.BlockSpec((block_b, h), lambda i: (i, 0)),
        ),
        compiler_params=pltpu.CompilerParams(
            dimension_semantics=("parallel",),
            vmem_limit_bytes=32 * 1024 * 1024),
    )(bf_t, ba_t, wg, bg, wbil, prelu_a)


# --------------------------------------------------------------------------- #
# Kernel B: bilinear discriminator (positive + CoLA shifted negatives)
# --------------------------------------------------------------------------- #
def _cola_disc_kernel(hw_ref, c_ref, bbil_ref, out_ref, *, negsamp_ratio):
    hw = hw_ref[...]                      # (B, H)  h_mv @ W_bil
    c = c_ref[...]                        # (B, H)  contexts
    bb = bbil_ref[...]                    # (1, 1)
    bsz = hw.shape[0]

    # All pairwise scores in one MXU matmul: s_t[j, i] = c[j] . hw[i]
    s_t = lax.dot_general(c, hw, (((1,), (1,)), ((), ())),
                          preferred_element_type=jnp.float32)       # (B, B)
    ctx = lax.broadcasted_iota(jnp.int32, (bsz, bsz), 0)   # context index j
    smp = lax.broadcasted_iota(jnp.int32, (bsz, bsz), 1)   # sample  index i

    # positive: context j == sample i
    rows = [jnp.sum(jnp.where(ctx == smp, s_t, 0.0),
                    axis=0, keepdims=True) + bb]
    # negatives: CoLA shift c_mi = cat(c_mi[-2:-1], c_mi[:-1]) applied r times
    #            <=> context index (i - r) mod (B - 1)
    for r in range(1, negsamp_ratio + 1):
        tgt = jnp.mod(smp - r, bsz - 1)
        rows.append(jnp.sum(jnp.where(ctx == tgt, s_t, 0.0),
                            axis=0, keepdims=True) + bb)

    out_ref[...] = jnp.concatenate(rows, axis=0)    # (1 + neg, B), lane-dense


def cola_discriminator(hw, c, b_bil, *, negsamp_ratio):
    bsz = hw.shape[0]
    vmem = pl.BlockSpec(memory_space=pltpu.MemorySpace.VMEM)
    return pl.pallas_call(
        functools.partial(_cola_disc_kernel, negsamp_ratio=negsamp_ratio),
        out_shape=jax.ShapeDtypeStruct((1 + negsamp_ratio, bsz), jnp.float32),
        in_specs=[vmem, vmem, vmem],
        out_specs=vmem,
    )(hw, c, b_bil)


# --------------------------------------------------------------------------- #
# Forward wrapper (JAX glue: subgraph gather + CoLA padding, then the kernels)
# --------------------------------------------------------------------------- #
def my_cola_forward(params, x, adj, all_idx, subgraphs, *, cur_batch_size,
                    subgraph_size, feat_dim, hidden, negsamp_ratio,
                    block_b=128):
    del hidden  # implied by the weight shapes
    b = cur_batch_size
    s = subgraph_size
    s1 = s + 1
    f = feat_dim

    # ---- CoLA batch assembly (same semantics as CoLA_Base) ----------------- #
    subg = subgraphs[all_idx]                                       # (B, S)
    cur_feat = x[0][subg]                                           # (B, S, F)
    cur_adj = adj[0][subg[:, :, None], subg[:, None, :]]            # (B, S, S)

    # ba = [[cur_adj, 0-col(last=1)], [0-row]] -> (B, S+1, S+1)
    ba = jnp.concatenate([cur_adj, jnp.zeros((b, 1, s), x.dtype)], axis=1)
    zero_col = jnp.zeros((b, s1, 1), x.dtype).at[:, -1, :].set(1.0)
    ba = jnp.concatenate([ba, zero_col], axis=2)
    # bf: zero-feature row inserted just before the (last) target node
    bf = jnp.concatenate([cur_feat[:, :-1, :],
                          jnp.zeros((b, 1, f), x.dtype),
                          cur_feat[:, -1:, :]], axis=1)             # (B, S+1, F)

    # ---- node-major, kernel-friendly layouts ------------------------------- #
    # TODO(synk): move this gather/pad into the kernel with scalar-prefetched
    #             subgraph indices + per-row DMA to save an HBM round trip.
    bf_t = jnp.transpose(bf, (1, 0, 2)).astype(jnp.bfloat16)        # (S1, B, F)
    ba_t = jnp.transpose(ba, (1, 0, 2)).astype(jnp.float32)         # (S1, B, S1)

    # batch block: multiple of 16 so the bf16 leading-dim collapse in the
    # kernel stays a zero-cost relabel.
    blk = max(16, min(block_b, -(-b // 16) * 16))
    blk = -(-blk // 16) * 16
    n_blk = -(-b // blk)
    bp = n_blk * blk
    if bp != b:
        bf_t = jnp.pad(bf_t, ((0, 0), (0, bp - b), (0, 0)))
        ba_t = jnp.pad(ba_t, ((0, 0), (0, bp - b), (0, 0)))

    c, hw = cola_embed(bf_t, ba_t,
                       params['w_gcn'].astype(jnp.bfloat16),
                       params['b_gcn'], params['w_bil'], params['prelu_a'],
                       block_b=blk)
    c, hw = c[:b], hw[:b]

    scores = cola_discriminator(hw, c, params['b_bil'],
                                negsamp_ratio=negsamp_ratio)        # (1+neg, B)
    # torch.cat order: [positives(B) ; negatives round 1 (B) ; ...], shape (.,1)
    return scores.reshape((1 + negsamp_ratio) * b, 1)


# --------------------------------------------------------------------------- #
# Pure-JAX reference (mirrors the PyTorch CoLA semantics exactly)
# --------------------------------------------------------------------------- #
def cola_reference(params, x, adj, all_idx, subgraphs, *, cur_batch_size,
                   subgraph_size, feat_dim, negsamp_ratio):
    b, s, f = cur_batch_size, subgraph_size, feat_dim
    s1 = s + 1
    subg = subgraphs[all_idx]
    cur_feat = x[0][subg]
    cur_adj = adj[0][subg[:, :, None], subg[:, None, :]]
    ba = jnp.concatenate([cur_adj, jnp.zeros((b, 1, s), x.dtype)], axis=1)
    zc = jnp.zeros((b, s1, 1), x.dtype).at[:, -1, :].set(1.0)
    ba = jnp.concatenate([ba, zc], axis=2)
    bf = jnp.concatenate([cur_feat[:, :-1, :], jnp.zeros((b, 1, f), x.dtype),
                          cur_feat[:, -1:, :]], axis=1)
    seq_fts = jnp.einsum('bnf,fh->bnh', bf, params['w_gcn'])
    h = jnp.einsum('bnm,bmh->bnh', ba, seq_fts) + params['b_gcn'][None]
    a = params['prelu_a'][0, 0]
    h = jnp.where(h > 0, h, a * h)
    c = jnp.mean(h[:, :-1, :], axis=1)
    h_mv = h[:, -1, :]
    hw = h_mv @ params['w_bil']
    bb = params['b_bil'][0, 0]
    scs = [jnp.sum(hw * c, axis=-1, keepdims=True) + bb]
    c_mi = c
    for _ in range(negsamp_ratio):
        c_mi = jnp.concatenate([c_mi[-2:-1, :], c_mi[:-1, :]], axis=0)
        scs.append(jnp.sum(hw * c_mi, axis=-1, keepdims=True) + bb)
    return jnp.concatenate(scs, axis=0)


# --------------------------------------------------------------------------- #
# Deterministic parameter init (shapes from MyCola / CoLA_Base __init__)
# --------------------------------------------------------------------------- #
def init_params(key, feat_dim, hidden):
    k1, k2, k3 = jax.random.split(key, 3)
    return {
        'w_gcn':   jax.random.normal(k1, (feat_dim, hidden), jnp.float32) * 0.1,
        'b_gcn':   jax.random.normal(k3, (1, hidden), jnp.float32) * 0.1,
        'w_bil':   jax.random.normal(k2, (hidden, hidden), jnp.float32) * 0.1,
        'prelu_a': jnp.full((1, 1), 0.25, jnp.float32),   # nn.PReLU() default
        'b_bil':   jnp.full((1, 1), 0.05, jnp.float32),
    }


# --------------------------------------------------------------------------- #
if __name__ == "__main__":
    # Small shapes consistent with the module
    num_nodes = 64
    feat_dim = 16          # x_dim
    hidden = 32            # config.hidden
    subgraph_size = 4
    negsamp_ratio = 1
    cur_batch_size = 32
    block_b = 16           # -> grid=(2,), exercises the batch pipeline

    key = jax.random.PRNGKey(0)
    kx, ka, ks, kp = jax.random.split(key, 4)

    x = jax.random.normal(kx, (1, num_nodes, feat_dim), jnp.float32)

    # symmetric, row-normalized adjacency with self-loops
    a = (jax.random.uniform(ka, (num_nodes, num_nodes)) > 0.7).astype(jnp.float32)
    a = jnp.clip(a + a.T + jnp.eye(num_nodes), 0.0, 1.0)
    adj = (a / jnp.sum(a, axis=1, keepdims=True))[None]           # (1, n, n)

    # random RWR-style subgraphs; target node placed last (CoLA convention)
    subgraphs = jax.random.randint(ks, (num_nodes, subgraph_size), 0, num_nodes)
    subgraphs = subgraphs.at[:, -1].set(jnp.arange(num_nodes)).astype(jnp.int32)
    all_idx = jnp.arange(cur_batch_size, dtype=jnp.int32)

    params = init_params(kp, feat_dim, hidden)

    fwd = jax.jit(functools.partial(
        my_cola_forward,
        cur_batch_size=cur_batch_size,     # static -> shapes are concrete
        subgraph_size=subgraph_size,
        feat_dim=feat_dim,
        hidden=hidden,
        negsamp_ratio=negsamp_ratio,
        block_b=block_b))

    logits = fwd(params, x, adj, all_idx, subgraphs)
    jax.block_until_ready(logits)

    ref = cola_reference(params, x, adj, all_idx, subgraphs,
                         cur_batch_size=cur_batch_size,
                         subgraph_size=subgraph_size,
                         feat_dim=feat_dim,
                         negsamp_ratio=negsamp_ratio)

    assert logits.shape == ((1 + negsamp_ratio) * cur_batch_size, 1)
    assert bool(jnp.all(jnp.isfinite(logits)))
    assert bool(jnp.allclose(logits, ref, rtol=5e-2, atol=5e-2)), \
        float(jnp.max(jnp.abs(logits - ref)))
    print("KERNEL_OK")
</pallas_src>

<mosaic_0001>
module attributes {stable_mosaic.version = 11 : i64} {
  func.func @_cola_embed_kernel(%arg0: i32, %arg1: memref<5x16x16xbf16, #tpu.memory_space<vmem>>, %arg2: memref<5x16x5xf32, #tpu.memory_space<vmem>>, %arg3: memref<16x32xbf16, #tpu.memory_space<vmem>>, %arg4: memref<1x32xf32, #tpu.memory_space<vmem>>, %arg5: memref<32x32xf32, #tpu.memory_space<vmem>>, %arg6: memref<1x1xf32, #tpu.memory_space<vmem>>, %arg7: memref<16x32xf32, #tpu.memory_space<vmem>>, %arg8: memref<16x32xf32, #tpu.memory_space<vmem>>) attributes {dimension_semantics = [#tpu.dimension_semantics<parallel>], iteration_bounds = array<i64: 2>, scalar_prefetch = 0 : i64, scratch_operands = 0 : i64, tpu.core_type = #tpu.core_type<tc>, window_params = [{transform_indices = @transform_0, window_bounds = array<i64: 5, 16, 16>}, {transform_indices = @transform_1, window_bounds = array<i64: 5, 16, 5>}, {pipeline_mode = #tpu.pipeline_mode<synchronous>, transform_indices = @transform_2, window_bounds = array<i64: 16, 32>}, {pipeline_mode = #tpu.pipeline_mode<synchronous>, transform_indices = @transform_3, window_bounds = array<i64: 1, 32>}, {pipeline_mode = #tpu.pipeline_mode<synchronous>, transform_indices = @transform_4, window_bounds = array<i64: 32, 32>}, {pipeline_mode = #tpu.pipeline_mode<synchronous>, transform_indices = @transform_5, window_bounds = array<i64: 1, 1>}, {transform_indices = @transform_6, window_bounds = array<i64: 16, 32>}, {transform_indices = @transform_7, window_bounds = array<i64: 16, 32>}]} {
    %c0 = arith.constant 0 : index
    %c0_0 = arith.constant 0 : index
    %0 = vector.load %arg3[%c0, %c0_0] : memref<16x32xbf16, #tpu.memory_space<vmem>>, vector<16x32xbf16>
    %c0_1 = arith.constant 0 : index
    %c0_2 = arith.constant 0 : index
    %1 = vector.load %arg4[%c0_1, %c0_2] : memref<1x32xf32, #tpu.memory_space<vmem>>, vector<1x32xf32>
    %c0_3 = arith.constant 0 : index
    %c0_4 = arith.constant 0 : index
    %2 = vector.load %arg5[%c0_3, %c0_4] : memref<32x32xf32, #tpu.memory_space<vmem>>, vector<32x32xf32>
    %c0_5 = arith.constant 0 : index
    %c0_6 = arith.constant 0 : index
    %3 = vector.load %arg6[%c0_5, %c0_6] : memref<1x1xf32, #tpu.memory_space<vmem>>, vector<1x1xf32>
    %c0_7 = arith.constant 0 : index
    %c0_8 = arith.constant 0 : index
    %c0_9 = arith.constant 0 : index
    %4 = vector.load %arg1[%c0_7, %c0_8, %c0_9] : memref<5x16x16xbf16, #tpu.memory_space<vmem>>, vector<5x16x16xbf16>
    %5 = vector.shape_cast %4 : vector<5x16x16xbf16> to vector<80x16xbf16>
    %cst = arith.constant dense<0.000000e+00> : vector<80x32xf32>
    %6 = tpu.matmul %5, %0, %cst {dimension_numbers = #tpu.dot_dimension_numbers<[1], [0], [0], [1], [0, 0, 1, 1], [], []>} : vector<80x16xbf16>, vector<16x32xbf16>, vector<80x32xf32> -> vector<80x32xf32>
    %7 = vector.extract_strided_slice %6 {offsets = [0, 0], sizes = [16, 32], strides = [1, 1]} : vector<80x32xf32> to vector<16x32xf32>
    %8 = vector.extract_strided_slice %6 {offsets = [16, 0], sizes = [16, 32], strides = [1, 1]} : vector<80x32xf32> to vector<16x32xf32>
    %9 = vector.extract_strided_slice %6 {offsets = [32, 0], sizes = [16, 32], strides = [1, 1]} : vector<80x32xf32> to vector<16x32xf32>
    %10 = vector.extract_strided_slice %6 {offsets = [48, 0], sizes = [16, 32], strides = [1, 1]} : vector<80x32xf32> to vector<16x32xf32>
    %11 = vector.extract_strided_slice %6 {offsets = [64, 0], sizes = [16, 32], strides = [1, 1]} : vector<80x32xf32> to vector<16x32xf32>
    %c0_10 = arith.constant 0 : index
    %c0_11 = arith.constant 0 : index
    %c0_12 = arith.constant 0 : index
    %12 = vector.load %arg2[%c0_10, %c0_11, %c0_12] : memref<5x16x5xf32, #tpu.memory_space<vmem>>, vector<1x16x5xf32>
    %13 = vector.shape_cast %12 : vector<1x16x5xf32> to vector<16x5xf32>
    %14 = vector.extract_strided_slice %13 {offsets = [0, 0], sizes = [16, 1], strides = [1, 1]} : vector<16x5xf32> to vector<16x1xf32>
    %15 = vector.broadcast %14 : vector<16x1xf32> to vector<16x32xf32>
    %16 = arith.mulf %15, %7 : vector<16x32xf32>
    %17 = vector.extract_strided_slice %13 {offsets = [0, 1], sizes = [16, 1], strides = [1, 1]} : vector<16x5xf32> to vector<16x1xf32>
    %18 = vector.broadcast %17 : vector<16x1xf32> to vector<16x32xf32>
    %19 = arith.mulf %18, %8 : vector<16x32xf32>
    %20 = arith.addf %16, %19 : vector<16x32xf32>
    %21 = vector.extract_strided_slice %13 {offsets = [0, 2], sizes = [16, 1], strides = [1, 1]} : vector<16x5xf32> to vector<16x1xf32>
    %22 = vector.broadcast %21 : vector<16x1xf32> to vector<16x32xf32>
    %23 = arith.mulf %22, %9 : vector<16x32xf32>
    %24 = arith.addf %20, %23 : vector<16x32xf32>
    %25 = vector.extract_strided_slice %13 {offsets = [0, 3], sizes = [16, 1], strides = [1, 1]} : vector<16x5xf32> to vector<16x1xf32>
    %26 = vector.broadcast %25 : vector<16x1xf32> to vector<16x32xf32>
    %27 = arith.mulf %26, %10 : vector<16x32xf32>
    %28 = arith.addf %24, %27 : vector<16x32xf32>
    %29 = vector.extract_strided_slice %13 {offsets = [0, 4], sizes = [16, 1], strides = [1, 1]} : vector<16x5xf32> to vector<16x1xf32>
    %30 = vector.broadcast %29 : vector<16x1xf32> to vector<16x32xf32>
    %31 = arith.mulf %30, %11 : vector<16x32xf32>
    %32 = arith.addf %28, %31 : vector<16x32xf32>
    %33 = vector.broadcast %1 : vector<1x32xf32> to vector<16x32xf32>
    %34 = arith.addf %32, %33 : vector<16x32xf32>
    %cst_13 = arith.constant 0.000000e+00 : f32
    %35 = vector.broadcast %cst_13 : f32 to vector<16x32xf32>
    %36 = arith.cmpf ogt, %34, %35 : vector<16x32xf32>
    %37 = vector.broadcast %3 : vector<1x1xf32> to vector<16x32xf32>
    %38 = arith.mulf %37, %34 : vector<16x32xf32>
    %39 = arith.select %36, %34, %38 : vector<16x32xi1>, vector<16x32xf32>
    %c1 = arith.constant 1 : index
    %c0_14 = arith.constant 0 : index
    %c0_15 = arith.constant 0 : index
    %40 = vector.load %arg2[%c1, %c0_14, %c0_15] : memref<5x16x5xf32, #tpu.memory_space<vmem>>, vector<1x16x5xf32>
    %41 = vector.shape_cast %40 : vector<1x16x5xf32> to vector<16x5xf32>
    %42 = vector.extract_strided_slice %41 {offsets = [0, 0], sizes = [16, 1], strides = [1, 1]} : vector<16x5xf32> to vector<16x1xf32>
    %43 = vector.broadcast %42 : vector<16x1xf32> to vector<16x32xf32>
    %44 = arith.mulf %43, %7 : vector<16x32xf32>
    %45 = vector.extract_strided_slice %41 {offsets = [0, 1], sizes = [16, 1], strides = [1, 1]} : vector<16x5xf32> to vector<16x1xf32>
    %46 = vector.broadcast %45 : vector<16x1xf32> to vector<16x32xf32>
    %47 = arith.mulf %46, %8 : vector<16x32xf32>
    %48 = arith.addf %44, %47 : vector<16x32xf32>
    %49 = vector.extract_strided_slice %41 {offsets = [0, 2], sizes = [16, 1], strides = [1, 1]} : vector<16x5xf32> to vector<16x1xf32>
    %50 = vector.broadcast %49 : vector<16x1xf32> to vector<16x32xf32>
    %51 = arith.mulf %50, %9 : vector<16x32xf32>
    %52 = arith.addf %48, %51 : vector<16x32xf32>
    %53 = vector.extract_strided_slice %41 {offsets = [0, 3], sizes = [16, 1], strides = [1, 1]} : vector<16x5xf32> to vector<16x1xf32>
    %54 = vector.broadcast %53 : vector<16x1xf32> to vector<16x32xf32>
    %55 = arith.mulf %54, %10 : vector<16x32xf32>
    %56 = arith.addf %52, %55 : vector<16x32xf32>
    %57 = vector.extract_strided_slice %41 {offsets = [0, 4], sizes = [16, 1], strides = [1, 1]} : vector<16x5xf32> to vector<16x1xf32>
    %58 = vector.broadcast %57 : vector<16x1xf32> to vector<16x32xf32>
    %59 = arith.mulf %58, %11 : vector<16x32xf32>
    %60 = arith.addf %56, %59 : vector<16x32xf32>
    %61 = vector.broadcast %1 : vector<1x32xf32> to vector<16x32xf32>
    %62 = arith.addf %60, %61 : vector<16x32xf32>
    %cst_16 = arith.constant 0.000000e+00 : f32
    %63 = vector.broadcast %cst_16 : f32 to vector<16x32xf32>
    %64 = arith.cmpf ogt, %62, %63 : vector<16x32xf32>
    %65 = vector.broadcast %3 : vector<1x1xf32> to vector<16x32xf32>
    %66 = arith.mulf %65, %62 : vector<16x32xf32>
    %67 = arith.select %64, %62, %66 : vector<16x32xi1>, vector<16x32xf32>
    %68 = arith.addf %39, %67 : vector<16x32xf32>
    %c2 = arith.constant 2 : index
    %c0_17 = arith.constant 0 : index
    %c0_18 = arith.constant 0 : index
    %69 = vector.load %arg2[%c2, %c0_17, %c0_18] : memref<5x16x5xf32, #tpu.memory_space<vmem>>, vector<1x16x5xf32>
    %70 = vector.shape_cast %69 : vector<1x16x5xf32> to vector<16x5xf32>
    %71 = vector.extract_strided_slice %70 {offsets = [0, 0], sizes = [16, 1], strides = [1, 1]} : vector<16x5xf32> to vector<16x1xf32>
    %72 = vector.broadcast %71 : vector<16x1xf32> to vector<16x32xf32>
    %73 = arith.mulf %72, %7 : vector<16x32xf32>
    %74 = vector.extract_strided_slice %70 {offsets = [0, 1], sizes = [16, 1], strides = [1, 1]} : vector<16x5xf32> to vector<16x1xf32>
    %75 = vector.broadcast %74 : vector<16x1xf32> to vector<16x32xf32>
    %76 = arith.mulf %75, %8 : vector<16x32xf32>
    %77 = arith.addf %73, %76 : vector<16x32xf32>
    %78 = vector.extract_strided_slice %70 {offsets = [0, 2], sizes = [16, 1], strides = [1, 1]} : vector<16x5xf32> to vector<16x1xf32>
    %79 = vector.broadcast %78 : vector<16x1xf32> to vector<16x32xf32>
    %80 = arith.mulf %79, %9 : vector<16x32xf32>
    %81 = arith.addf %77, %80 : vector<16x32xf32>
    %82 = vector.extract_strided_slice %70 {offsets = [0, 3], sizes = [16, 1], strides = [1, 1]} : vector<16x5xf32> to vector<16x1xf32>
    %83 = vector.broadcast %82 : vector<16x1xf32> to vector<16x32xf32>
    %84 = arith.mulf %83, %10 : vector<16x32xf32>
    %85 = arith.addf %81, %84 : vector<16x32xf32>
    %86 = vector.extract_strided_slice %70 {offsets = [0, 4], sizes = [16, 1], strides = [1, 1]} : vector<16x5xf32> to vector<16x1xf32>
    %87 = vector.broadcast %86 : vector<16x1xf32> to vector<16x32xf32>
    %88 = arith.mulf %87, %11 : vector<16x32xf32>
    %89 = arith.addf %85, %88 : vector<16x32xf32>
    %90 = vector.broadcast %1 : vector<1x32xf32> to vector<16x32xf32>
    %91 = arith.addf %89, %90 : vector<16x32xf32>
    %cst_19 = arith.constant 0.000000e+00 : f32
    %92 = vector.broadcast %cst_19 : f32 to vector<16x32xf32>
    %93 = arith.cmpf ogt, %91, %92 : vector<16x32xf32>
    %94 = vector.broadcast %3 : vector<1x1xf32> to vector<16x32xf32>
    %95 = arith.mulf %94, %91 : vector<16x32xf32>
    %96 = arith.select %93, %91, %95 : vector<16x32xi1>, vector<16x32xf32>
    %97 = arith.addf %68, %96 : vector<16x32xf32>
    %c3 = arith.constant 3 : index
    %c0_20 = arith.constant 0 : index
    %c0_21 = arith.constant 0 : index
    %98 = vector.load %arg2[%c3, %c0_20, %c0_21] : memref<5x16x5xf32, #tpu.memory_space<vmem>>, vector<1x16x5xf32>
    %99 = vector.shape_cast %98 : vector<1x16x5xf32> to vector<16x5xf32>
    %100 = vector.extract_strided_slice %99 {offsets = [0, 0], sizes = [16, 1], strides = [1, 1]} : vector<16x5xf32> to vector<16x1xf32>
    %101 = vector.broadcast %100 : vector<16x1xf32> to vector<16x32xf32>
    %102 = arith.mulf %101, %7 : vector<16x32xf32>
    %103 = vector.extract_strided_slice %99 {offsets = [0, 1], sizes = [16, 1], strides = [1, 1]} : vector<16x5xf32> to vector<16x1xf32>
    %104 = vector.broadcast %103 : vector<16x1xf32> to vector<16x32xf32>
    %105 = arith.mulf %104, %8 : vector<16x32xf32>
    %106 = arith.addf %102, %105 : vector<16x32xf32>
    %107 = vector.extract_strided_slice %99 {offsets = [0, 2], sizes = [16, 1], strides = [1, 1]} : vector<16x5xf32> to vector<16x1xf32>
    %108 = vector.broadcast %107 : vector<16x1xf32> to vector<16x32xf32>
    %109 = arith.mulf %108, %9 : vector<16x32xf32>
    %110 = arith.addf %106, %109 : vector<16x32xf32>
    %111 = vector.extract_strided_slice %99 {offsets = [0, 3], sizes = [16, 1], strides = [1, 1]} : vector<16x5xf32> to vector<16x1xf32>
    %112 = vector.broadcast %111 : vector<16x1xf32> to vector<16x32xf32>
    %113 = arith.mulf %112, %10 : vector<16x32xf32>
    %114 = arith.addf %110, %113 : vector<16x32xf32>
    %115 = vector.extract_strided_slice %99 {offsets = [0, 4], sizes = [16, 1], strides = [1, 1]} : vector<16x5xf32> to vector<16x1xf32>
    %116 = vector.broadcast %115 : vector<16x1xf32> to vector<16x32xf32>
    %117 = arith.mulf %116, %11 : vector<16x32xf32>
    %118 = arith.addf %114, %117 : vector<16x32xf32>
    %119 = vector.broadcast %1 : vector<1x32xf32> to vector<16x32xf32>
    %120 = arith.addf %118, %119 : vector<16x32xf32>
    %cst_22 = arith.constant 0.000000e+00 : f32
    %121 = vector.broadcast %cst_22 : f32 to vector<16x32xf32>
    %122 = arith.cmpf ogt, %120, %121 : vector<16x32xf32>
    %123 = vector.broadcast %3 : vector<1x1xf32> to vector<16x32xf32>
    %124 = arith.mulf %123, %120 : vector<16x32xf32>
    %125 = arith.select %122, %120, %124 : vector<16x32xi1>, vector<16x32xf32>
    %126 = arith.addf %97, %125 : vector<16x32xf32>
    %c4 = arith.constant 4 : index
    %c0_23 = arith.constant 0 : index
    %c0_24 = arith.constant 0 : index
    %127 = vector.load %arg2[%c4, %c0_23, %c0_24] : memref<5x16x5xf32, #tpu.memory_space<vmem>>, vector<1x16x5xf32>
    %128 = vector.shape_cast %127 : vector<1x16x5xf32> to vector<16x5xf32>
    %129 = vector.extract_strided_slice %128 {offsets = [0, 0], sizes = [16, 1], strides = [1, 1]} : vector<16x5xf32> to vector<16x1xf32>
    %130 = vector.broadcast %129 : vector<16x1xf32> to vector<16x32xf32>
    %131 = arith.mulf %130, %7 : vector<16x32xf32>
    %132 = vector.extract_strided_slice %128 {offsets = [0, 1], sizes = [16, 1], strides = [1, 1]} : vector<16x5xf32> to vector<16x1xf32>
    %133 = vector.broadcast %132 : vector<16x1xf32> to vector<16x32xf32>
    %134 = arith.mulf %133, %8 : vector<16x32xf32>
    %135 = arith.addf %131, %134 : vector<16x32xf32>
    %136 = vector.extract_strided_slice %128 {offsets = [0, 2], sizes = [16, 1], strides = [1, 1]} : vector<16x5xf32> to vector<16x1xf32>
    %137 = vector.broadcast %136 : vector<16x1xf32> to vector<16x32xf32>
    %138 = arith.mulf %137, %9 : vector<16x32xf32>
    %139 = arith.addf %135, %138 : vector<16x32xf32>
    %140 = vector.extract_strided_slice %128 {offsets = [0, 3], sizes = [16, 1], strides = [1, 1]} : vector<16x5xf32> to vector<16x1xf32>
    %141 = vector.broadcast %140 : vector<16x1xf32> to vector<16x32xf32>
    %142 = arith.mulf %141, %10 : vector<16x32xf32>
    %143 = arith.addf %139, %142 : vector<16x32xf32>
    %144 = vector.extract_strided_slice %128 {offsets = [0, 4], sizes = [16, 1], strides = [1, 1]} : vector<16x5xf32> to vector<16x1xf32>
    %145 = vector.broadcast %144 : vector<16x1xf32> to vector<16x32xf32>
    %146 = arith.mulf %145, %11 : vector<16x32xf32>
    %147 = arith.addf %143, %146 : vector<16x32xf32>
    %148 = vector.broadcast %1 : vector<1x32xf32> to vector<16x32xf32>
    %149 = arith.addf %147, %148 : vector<16x32xf32>
    %cst_25 = arith.constant 0.000000e+00 : f32
    %150 = vector.broadcast %cst_25 : f32 to vector<16x32xf32>
    %151 = arith.cmpf ogt, %149, %150 : vector<16x32xf32>
    %152 = vector.broadcast %3 : vector<1x1xf32> to vector<16x32xf32>
    %153 = arith.mulf %152, %149 : vector<16x32xf32>
    %154 = arith.select %151, %149, %153 : vector<16x32xi1>, vector<16x32xf32>
    %cst_26 = arith.constant 2.500000e-01 : f32
    %155 = vector.broadcast %cst_26 : f32 to vector<16x32xf32>
    %156 = arith.mulf %126, %155 : vector<16x32xf32>
    %c0_27 = arith.constant 0 : index
    %c0_28 = arith.constant 0 : index
    %157 = vector.load %arg7[%c0_27, %c0_28] : memref<16x32xf32, #tpu.memory_space<vmem>>, vector<16x32xf32>
    tpu.vector_store %arg7[%c0_27, %c0_28], %156 {strides = array<i32>} : memref<16x32xf32, #tpu.memory_space<vmem>>, vector<16x32xf32>,
    %cst_29 = arith.constant dense<0.000000e+00> : vector<16x32xf32>
    %158 = tpu.matmul %154, %2, %cst_29 {dimension_numbers = #tpu.dot_dimension_numbers<[1], [0], [0], [1], [0, 0, 1, 1], [], []>} : vector<16x32xf32>, vector<32x32xf32>, vector<16x32xf32> -> vector<16x32xf32>
    %c0_30 = arith.constant 0 : index
    %c0_31 = arith.constant 0 : index
    %159 = vector.load %arg8[%c0_30, %c0_31] : memref<16x32xf32, #tpu.memory_space<vmem>>, vector<16x32xf32>
    tpu.vector_store %arg8[%c0_30, %c0_31], %158 {strides = array<i32>} : memref<16x32xf32, #tpu.memory_space<vmem>>, vector<16x32xf32>,
    return
  }
  func.func @transform_0(%arg0: i32) -> (i32, i32, i32) {
    %c0_i32 = arith.constant 0 : i32
    %c0_i32_0 = arith.constant 0 : i32
    %c0_i32_1 = arith.constant 0 : i32
    return %c0_i32, %arg0, %c0_i32_0 : i32, i32, i32
  }
  func.func @transform_1(%arg0: i32) -> (i32, i32, i32) {
    %c0_i32 = arith.constant 0 : i32
    %c0_i32_0 = arith.constant 0 : i32
    %c0_i32_1 = arith.constant 0 : i32
    return %c0_i32, %arg0, %c0_i32_0 : i32, i32, i32
  }
  func.func @transform_2(%arg0: i32) -> (i32, i32) {
    %c0_i32 = arith.constant 0 : i32
    %c0_i32_0 = arith.constant 0 : i32
    %c0_i32_1 = arith.constant 0 : i32
    return %c0_i32, %c0_i32_0 : i32, i32
  }
  func.func @transform_3(%arg0: i32) -> (i32, i32) {
    %c0_i32 = arith.constant 0 : i32
    %c0_i32_0 = arith.constant 0 : i32
    %c0_i32_1 = arith.constant 0 : i32
    return %c0_i32, %c0_i32_0 : i32, i32
  }
  func.func @transform_4(%arg0: i32) -> (i32, i32) {
    %c0_i32 = arith.constant 0 : i32
    %c0_i32_0 = arith.constant 0 : i32
    %c0_i32_1 = arith.constant 0 : i32
    return %c0_i32, %c0_i32_0 : i32, i32
  }
  func.func @transform_5(%arg0: i32) -> (i32, i32) {
    %c0_i32 = arith.constant 0 : i32
    %c0_i32_0 = arith.constant 0 : i32
    %c0_i32_1 = arith.constant 0 : i32
    return %c0_i32, %c0_i32_0 : i32, i32
  }
  func.func @transform_6(%arg0: i32) -> (i32, i32) {
    %c0_i32 = arith.constant 0 : i32
    %c0_i32_0 = arith.constant 0 : i32
    return %arg0, %c0_i32 : i32, i32
  }
  func.func @transform_7(%arg0: i32) -> (i32, i32) {
    %c0_i32 = arith.constant 0 : i32
    %c0_i32_0 = arith.constant 0 : i32
    return %arg0, %c0_i32 : i32, i32
  }
}

module attributes {stable_mosaic.version = 11 : i64} {
  func.func @_cola_disc_kernel(%arg0: memref<32x32xf32, #tpu.memory_space<vmem>>, %arg1: memref<32x32xf32, #tpu.memory_space<vmem>>, %arg2: memref<1x1xf32, #tpu.memory_space<vmem>>, %arg3: memref<2x32xf32, #tpu.memory_space<vmem>>) attributes {dimension_semantics = [], scalar_prefetch = 0 : i64, scratch_operands = 0 : i64, tpu.core_type = #tpu.core_type<tc>} {
    %c0 = arith.constant 0 : index
    %c0_0 = arith.constant 0 : index
    %0 = vector.load %arg0[%c0, %c0_0] : memref<32x32xf32, #tpu.memory_space<vmem>>, vector<32x32xf32>
    %c0_1 = arith.constant 0 : index
    %c0_2 = arith.constant 0 : index
    %1 = vector.load %arg1[%c0_1, %c0_2] : memref<32x32xf32, #tpu.memory_space<vmem>>, vector<32x32xf32>
    %c0_3 = arith.constant 0 : index
    %c0_4 = arith.constant 0 : index
    %2 = vector.load %arg2[%c0_3, %c0_4] : memref<1x1xf32, #tpu.memory_space<vmem>>, vector<1x1xf32>
    %cst = arith.constant dense<0.000000e+00> : vector<32x32xf32>
    %3 = tpu.matmul %1, %0, %cst {dimension_numbers = #tpu.dot_dimension_numbers<[1], [1], [0], [0], [0, 0, 1, 0], [], []>} : vector<32x32xf32>, vector<32x32xf32>, vector<32x32xf32> -> vector<32x32xf32>
    %4 = tpu.iota {dimensions = array<i32: 0>} : vector<32x32xi32>
    %5 = tpu.iota {dimensions = array<i32: 1>} : vector<32x32xi32>
    %6 = arith.cmpi eq, %4, %5 : vector<32x32xi32>
    %cst_5 = arith.constant 0.000000e+00 : f32
    %7 = vector.broadcast %cst_5 : f32 to vector<32x32xf32>
    %8 = arith.select %6, %3, %7 : vector<32x32xi1>, vector<32x32xf32>
    %cst_6 = arith.constant dense<0.000000e+00> : vector<32xf32>
    %9 = vector.multi_reduction <add>, %8, %cst_6 [0] : vector<32x32xf32> to vector<32xf32>
    %10 = vector.shape_cast %9 : vector<32xf32> to vector<1x32xf32>
    %11 = vector.broadcast %2 : vector<1x1xf32> to vector<1x32xf32>
    %12 = arith.addf %10, %11 : vector<1x32xf32>
    %c1_i32 = arith.constant 1 : i32
    %13 = vector.broadcast %c1_i32 : i32 to vector<32x32xi32>
    %14 = arith.subi %5, %13 : vector<32x32xi32>
    %c31_i32 = arith.constant 31 : i32
    %c0_i32 = arith.constant 0 : i32
    %15 = arith.cmpi eq, %c31_i32, %c0_i32 : i32
    %c1_i32_7 = arith.constant 1 : i32
    %16 = arith.select %15, %c1_i32_7, %c31_i32 : i32
    %17 = vector.broadcast %16 : i32 to vector<32x32xi32>
    %18 = arith.remsi %14, %17 : vector<32x32xi32>
    %c0_i32_8 = arith.constant 0 : i32
    %19 = vector.broadcast %c0_i32_8 : i32 to vector<32x32xi32>
    %20 = arith.cmpi ne, %18, %19 : vector<32x32xi32>
    %c0_i32_9 = arith.constant 0 : i32
    %21 = vector.broadcast %c0_i32_9 : i32 to vector<32x32xi32>
    %22 = arith.cmpi slt, %18, %21 : vector<32x32xi32>
    %c0_i32_10 = arith.constant 0 : i32
    %23 = arith.cmpi slt, %16, %c0_i32_10 : i32
    %24 = vector.broadcast %23 : i1 to vector<32x32xi1>
    %25 = vector.broadcast %24 : vector<32x32xi1> to vector<32x32xi1>
    %26 = arith.xori %22, %25 : vector<32x32xi1>
    %27 = arith.andi %26, %20 : vector<32x32xi1>
    %28 = vector.broadcast %16 : i32 to vector<32x32xi32>
    %29 = arith.addi %18, %28 : vector<32x32xi32>
    %30 = arith.select %27, %29, %18 : vector<32x32xi1>, vector<32x32xi32>
    %31 = arith.cmpi eq, %4, %30 : vector<32x32xi32>
    %cst_11 = arith.constant 0.000000e+00 : f32
    %32 = vector.broadcast %cst_11 : f32 to vector<32x32xf32>
    %33 = arith.select %31, %3, %32 : vector<32x32xi1>, vector<32x32xf32>
    %cst_12 = arith.constant dense<0.000000e+00> : vector<32xf32>
    %34 = vector.multi_reduction <add>, %33, %cst_12 [0] : vector<32x32xf32> to vector<32xf32>
    %35 = vector.shape_cast %34 : vector<32xf32> to vector<1x32xf32>
    %36 = vector.broadcast %2 : vector<1x1xf32> to vector<1x32xf32>
    %37 = arith.addf %35, %36 : vector<1x32xf32>
    %38 = tpu.concatenate %12, %37 in 0 : vector<1x32xf32>, vector<1x32xf32> -> vector<2x32xf32>
    %c0_13 = arith.constant 0 : index
    %c0_14 = arith.constant 0 : index
    %39 = vector.load %arg3[%c0_13, %c0_14] : memref<2x32xf32, #tpu.memory_space<vmem>>, vector<2x32xf32>
    tpu.vector_store %arg3[%c0_13, %c0_14], %38 {strides = array<i32>} : memref<2x32xf32, #tpu.memory_space<vmem>>, vector<2x32xf32>,
    return
  }
}

</mosaic_0001>

<bundles_post_ra>
// kernel: my_cola_forward.3
= control target key start
LH: loop header
LB: loop body
LE: loop exit
PB: predicated region body
PF: predicated region fallthrough
CT: control target
= control target key end

     0   :  { %vm25_vm0 = vcmask 261120   ;;  %v275_v3 = vmov 0   ;;  %v135_v14 = vlaneseq  ;;  %vm215_vm15 = vcmask 1040384   ;;  %s365_s0 = inlined_call_operand.vmem [shape: f32[32,32], index: 0, kind: input, shape index: {}]   ;;  %s366_s1 = inlined_call_operand.vmem [shape: f32[32,32], index: 1, kind: input, shape index: {}]   ;;  %s367_s2 = inlined_call_operand.<no memory space> [shape: f32[1,1], index: 2, kind: input, shape index: {}]   ;;  %s368_s3 = inlined_call_operand.vmem [shape: f32[2,32], index: 3, kind: output, shape index: {}]  }
   0x1   :  { %v16_v0 = vld [vmem:[%s365_s0] sm:$0xff]  ;;  %v17_v1 = vld [vmem:[%s365_s0 + $0x8] sm:$0xff]  ;;  %vm304_vm1 = vmpackc.low %vm25_vm0, %vm25_vm0  ;;  %274 = vset.pattern.permute.xlu0 %v275_v3  ;;  %v8_v4 = vstv %s367_s2 }
   0x2   :  { %v255_v5 = vpack.c.bf16 %v17_v1, %v16_v0  ;;  %v18_v6 = vld [vmem:[%s365_s0 + $0x10] sm:$0xff]  ;;  %v19_v7 = vld [vmem:[%s365_s0 + $0x18] sm:$0xff]  ;;  %v20_v8 = vld [vmem:[%s366_s1] sm:$0xff]  ;;  %9 = vst [vmem:[#allocation2] sm:$0x1] %v8_v4  ;;  %v141_v15 = vand.u32 127, %v135_v14 }
   0x3   :  { %v261_v9 = vpack.c.bf16 %v19_v7, %v18_v6  ;;  %249 = vmatprep.mubr.msk.f32.mxu0 %vm25_vm0, %v20_v8  ;;  %v22_v10 = vld [vmem:[%s366_s1 + $0x10] sm:$0xff]  ;;  %v21_v12 = vld [vmem:[%s366_s1 + $0x8] sm:$0xff]  ;;  %v23_v13 = vld [vmem:[%s366_s1 + $0x18] sm:$0xff]  ;;  %v136_v28 = vshrl.u32 %v135_v14, 7 }
   0x4   :  { %257 = vmatprep.subr.msk.bf16.mxu0 %vm304_vm1, %v255_v5  ;;  %267 = vmatprep.subr.msk.bf16.mxu1 %vm304_vm1, %v255_v5  ;;  %v231_v16 = vadd.s32 4294967295, %v141_v15 }
   0x5   :  { %260 = vmatpush3.bf16.xpose.msk.msra.mxu0 %vm304_vm1, %v255_v5  ;;  %269 = vmatpush3.bf16.xpose.msk.msra.mxu1 %vm304_vm1, %v255_v5  ;;  %v137_v30 = vadd.s32 8, %v136_v28  ;;  %v139_v31 = vadd.s32 24, %v136_v28  ;;  %v138_v33 = vadd.s32 16, %v136_v28  ;;  %vm142_vm10 = vcmp.eq.s32.totalorder %v136_v28, %v141_v15 }
   0x6   :  { %263 = vmatprep.subr.msk.bf16.mxu0 %vm304_vm1, %v261_v9  ;;  %268 = vmatprep.subr.msk.bf16.mxu1 %vm304_vm1, %v261_v9  ;;  %v175_v17 = vsub.s32 0, %v231_v16  ;;  %vm174_vm3 = vcmp.lt.s32.totalorder %v231_v16, 0  ;;  %v170_v0 = vsub.s32 0, %v136_v28 }
   0x7   :  { %252 = vmatprep.mubr.msk.f32.mxu1 %vm25_vm0, %v22_v10  ;;  %vm143_vm7 = vcmp.eq.s32.totalorder %v137_v30, %v141_v15  ;;  %vm145_vm12 = vcmp.eq.s32.totalorder %v139_v31, %v141_v15  ;;  %vm144_vm13 = vcmp.eq.s32.totalorder %v138_v33, %v141_v15 }
   0x8   :  { %v232_v18 = vmin.u32 %v231_v16, %v175_v17 }
   0x9   :  { %v24_v11 = vld [vmem:[#allocation2] sm:$0x1] }
   0xa   :  { %165 = vperm.xlu0 %274, %v24_v11   ;;  %v349_v19 = vmul.u32.u64.low 2216757314, %v232_v18  ;;  %v350_v20 = vmul.u32.u64.high 2216757314, %v232_v18, %v349_v19 }
   0xc   :  { %vm180_vm2 = vc.u32 %v349_v19, 2216757314 }
   0xd   :  { %266 = vmatpush3.bf16.xpose.msk.msra.mxu0 %vm304_vm1, %v261_v9  ;;  %270 = vmatpush3.bf16.xpose.msk.msra.mxu1 %vm304_vm1, %v261_v9  ;;  %v181_v21 = vsel %vm180_vm2, 1, %v275_v3  ;;  %vm217_vm1 = vcmask 254976  }
   0xe   :  { %v182_v22 = vadd.s32 %v350_v20, %v181_v21 }
  0x10   :  { %v183_v23 = vshrl.u32 %v182_v22, 4 }
  0x12   :  { %v184_v24 = vmul.u32 31, %v183_v23 }
  0x14   :  { %250 = vmatmul.mubr.msk.f32.vlgmr.msra.gmra.mrb[0].mxu0 %vm25_vm0, %v21_v12  ;;  %253 = vmatmul.mubr.msk.f32.vlgmr.msra.gmra.mrb[0].mxu1 %vm25_vm0, %v23_v13  ;;  %v185_v25 = vsub.s32 %v232_v18, %v184_v24 }
  0x16   :  { %v186_v26 = vsub.s32 0, %v185_v25 }
  0x18   :  { %v187_v27 = vsel %vm174_vm3, %v186_v26, %v185_v25 }
  0x19   :  { %vm188_vm4 = vcmp.ne.s32.totalorder %v187_v27, 0  ;;  %vm189_vm5 = vcmp.lt.s32.totalorder %v187_v27, 0  ;;  %v191_v29 = vadd.s32 31, %v187_v27 }
  0x1a   :  { %vm190_vm6 = vmand %vm189_vm5, %vm188_vm4 }
  0x1b   :  { %v192_v32 = vsel %vm190_vm6, %v191_v29, %v187_v27 }
  0x1c   :  { %vm194_vm8 = vcmp.eq.s32.totalorder %v137_v30, %v192_v32  ;;  %vm196_vm9 = vcmp.eq.s32.totalorder %v139_v31, %v192_v32  ;;  %vm193_vm11 = vcmp.eq.s32.totalorder %v136_v28, %v192_v32  ;;  %vm195_vm14 = vcmp.eq.s32.totalorder %v138_v33, %v192_v32 }
  0x89   :  { %v166_v3 = vpop.permute.xlu0 %165 }
  0x8a   :  { %v171_v7 = vrot.slane %v166_v3, %v170_v0 }
  0xe7   :  { %v251_v34 = vpop.f32.mrb[0].mxu0  ;;  %v254_v35 = vpop.f32.mrb[0].mxu1 }
  0xe8   :  { %v147_v36 = vsel %vm143_vm7, %v251_v34, 0.0  ;;  %v198_v37 = vsel %vm194_vm8, %v251_v34, 0.0  ;;  %v116_v38 = vpop.f32.mrb[1].mxu0  ;;  %v200_v39 = vsel %vm196_vm9, %v254_v35, 0.0  ;;  %v126_v40 = vpop.f32.mrb[1].mxu1  ;;  %v149_v47 = vsel %vm145_vm12, %v254_v35, 0.0 }
  0xe9   :  { %v151_v41 = vsel %vm25_vm0, %v147_v36, 0.0  ;;  %v202_v42 = vsel %vm25_vm0, %v198_v37, 0.0  ;;  %v146_v43 = vsel %vm142_vm10, %v116_v38, 0.0  ;;  %v197_v44 = vsel %vm193_vm11, %v116_v38, 0.0 }
  0xea   :  { %v150_v45 = vsel %vm25_vm0, %v146_v43, 0.0  ;;  %v201_v46 = vsel %vm25_vm0, %v197_v44, 0.0  ;;  %v148_v50 = vsel %vm144_vm13, %v126_v40, 0.0  ;;  %v199_v51 = vsel %vm195_vm14, %v126_v40, 0.0 }
  0xeb   :  { %v152_v48 = vadd.f32 %v151_v41, %v150_v45  ;;  %v203_v49 = vadd.f32 %v202_v42, %v201_v46  ;;  %v153_v52 = vsel %vm25_vm0, %v148_v50, 0.0  ;;  %v204_v53 = vsel %vm25_vm0, %v199_v51, 0.0 }
  0xec   :  { %v155_v56 = vsel %vm25_vm0, %v149_v47, 0.0  ;;  %v206_v57 = vsel %vm25_vm0, %v200_v39, 0.0 }
  0xed   :  { %v154_v54 = vadd.f32 %v153_v52, %v152_v48  ;;  %v205_v55 = vadd.f32 %v204_v53, %v203_v49 }
  0xef   :  { %v156_v58 = vadd.f32 %v155_v56, %v154_v54  ;;  %v207_v59 = vadd.f32 %v206_v57, %v205_v55 }
  0xf1   :  { %v157_v60 = vrot.slane %v156_v58, 4  ;;  %v208_v61 = vrot.slane %v207_v59, 4 }
  0xf3   :  { %v158_v62 = vadd.f32 %v157_v60, %v156_v58  ;;  %v209_v63 = vadd.f32 %v208_v61, %v207_v59 }
  0xf5   :  { %v159_v1 = vrot.slane %v158_v62, 2  ;;  %v210_v2 = vrot.slane %v209_v63, 2 }
  0xf7   :  { %v160_v4 = vadd.f32 %v159_v1, %v158_v62  ;;  %v211_v5 = vadd.f32 %v210_v2, %v209_v63 }
  0xf9   :  { %v161_v6 = vrot.slane %v160_v4, 1  ;;  %v212_v8 = vrot.slane %v211_v5, 1 }
  0xfb   :  { %v162_v9 = vadd.f32 %v161_v6, %v160_v4  ;;  %v213_v10 = vadd.f32 %v212_v8, %v211_v5 }
  0xfd   :  { %v172_v11 = vadd.f32 %v171_v7, %v162_v9  ;;  %v214_v12 = vadd.f32 %v213_v10, %v171_v7 }
  0xff   :  { %v216_v13 = vsel %vm215_vm15, %v172_v11, %v214_v12 }
 0x100   :  { %218 = vst.msk [vmem:[%s368_s3] sm:$0x3] %vm217_vm1, %v216_v13 }

// kernel: my_cola_forward.2
= control target key start
LH: loop header
LB: loop body
LE: loop exit
PB: predicated region body
PF: predicated region fallthrough
CT: control target
= control target key end

     0   :  { %s1729_s0 = inlined_call_operand.vmem [shape: bf16[5,32,16], index: 0, kind: input, shape index: {}]   ;;  %s1730_s1 = inlined_call_operand.vmem [shape: f32[5,32,5], index: 1, kind: input, shape index: {}]   ;;  %s1731_s2 = inlined_call_operand.vmem [shape: bf16[16,32], index: 2, kind: input, shape index: {}]   ;;  %s1732_s3 = inlined_call_operand.vmem [shape: f32[1,32], index: 3, kind: input, shape index: {}]   ;;  %s1733_s4 = inlined_call_operand.vmem [shape: f32[32,32], index: 4, kind: input, shape index: {}]   ;;  %s1734_s5 = inlined_call_operand.<no memory space> [shape: f32[1,1], index: 5, kind: input, shape index: {}]   ;;  %s1735_s6 = inlined_call_operand.vmem [shape: f32[32,32], index: 6, kind: output, shape index: {0}]   ;;  %s1736_s7 = inlined_call_operand.vmem [shape: f32[32,32], index: 7, kind: output, shape index: {1}]  }
   0x1   :  { %v13_v0 = vstv %s1734_s5 }
   0x2   :  { %14 = vst [vmem:[#allocation2] sm:$0x1] %v13_v0 }
   0x3   :  { %s1428_s26 = smov 0   ;;  %s1430_s27 = smov 0  }
   0x4   :  { %s1432_s28 = smov 0  }
   0x5 LB: > { %s1183_s5 = sadd.s32 4294967295, %s1376_s28   ;;  %s1445_s29 = sadd.s32 1, %s1376_s28   ;;  %s1376_s28 = sphi %s1432_s28, %s1740_s28   ;;  %s1372_s27 = sphi %s1430_s27, %s1739_s27   ;;  %s1368_s26 = sphi %s1428_s26, %s1738_s26  }
   0x6   : > { %s24_s30 = ssub.s32 %s1376_s28, %s1445_s29  ;;  %s27_s8 = sadd.s32 1, %s1372_s27 }
   0x7   : > { %p25_p0 = scmp.eq.s32.totalorder %s24_s30, 0  ;;  %p34_p1 = scmp.ne.s32.totalorder %s1372_s27, %s1368_s26 }
   0x8   : > { %p35_p2 = scmp.eq.s32.totalorder %s1376_s28, 0  ;;  %p1186_p4 = scmp.ge.s32.totalorder %s1376_s28, 2 }
   0x9   : > { %s1454_s9 = scalar_select %p25_p0, %s1372_s27, %s27_s8  }
   0xa   : > { %p1456_p3 = por %p35_p2, %p34_p1  ;;  %234 = sbr.rel (%p1186_p4) target bundleno = 33 (0x21), region = 32 }
  0x11   : > { %237 = sbr.rel (!%p1456_p3) target bundleno = 24 (0x18), region = 36  ;;  %s239_s11 = sand.u32 (%p1456_p3), 1, %s1372_s27  }
  0x12   : > { %s1221_s12 = sshll.u32 (%p1456_p3), %s1376_s28, 3  ;;  %s1278_s13 = smul.u32 (%p1456_p3), 40, %s239_s11 }
  0x13   : > { %s244_s16 = scalar_lea.vmem (%p1456_p3), %s1729_s0, %s1221_s12 }
  0x14   : > { %v260_v1 = vld [vmem:[%s244_s16] sm:$0xff] (%p1456_p3)   ;;  %v264_v2 = vld [vmem:[%s244_s16 + $0x10] sm:$0xff] (%p1456_p3)   ;;  %s241_s17 = scalar_lea.vmem (%p1456_p3), [#allocation3], %s1278_s13 }
  0x15   : > { %v268_v3 = vld [vmem:[%s244_s16 + $0x20] sm:$0xff] (%p1456_p3)   ;;  %v272_v4 = vld [vmem:[%s244_s16 + $0x30] sm:$0xff] (%p1456_p3)   ;;  %261 = vst [vmem:[%s241_s17] sm:$0xff] (%p1456_p3), %v260_v1   ;;  %265 = vst [vmem:[%s241_s17 + $0x8] sm:$0xff] (%p1456_p3), %v264_v2  }
  0x16   : > { %v276_v5 = vld [vmem:[%s244_s16 + $0x40] sm:$0xff] (%p1456_p3)   ;;  %269 = vst [vmem:[%s241_s17 + $0x10] sm:$0xff] (%p1456_p3), %v268_v3   ;;  %273 = vst [vmem:[%s241_s17 + $0x18] sm:$0xff] (%p1456_p3), %v272_v4  }
  0x17   : > { %277 = vst [vmem:[%s241_s17 + $0x20] sm:$0xff] (%p1456_p3), %v276_v5  }
  0x18 PF: > { %322 = sbr.rel (!%p1456_p3) target bundleno = 33 (0x21), region = 77  ;;  %s324_s18 = sand.u32 (%p1456_p3), 1, %s1372_s27  }
  0x19   : > { %s1222_s19 = sshll.u32 (%p1456_p3), %s1376_s28, 4  ;;  %s1279_s20 = smul.u32 (%p1456_p3), 80, %s324_s18 }
  0x1a   : > { %s329_s23 = scalar_lea.vmem (%p1456_p3), %s1730_s1, %s1222_s19 }
  0x1b   : > { %v375_v6 = vld [vmem:[%s329_s23] sm:$0xff] (%p1456_p3)  ;;  %v377_v7 = vld [vmem:[%s329_s23 + $0x8] sm:$0xff] (%p1456_p3)  ;;  %s326_s24 = scalar_lea.vmem (%p1456_p3), [#allocation4], %s1279_s20 }
  0x1c   : > { %v379_v8 = vld [vmem:[%s329_s23 + $0x20] sm:$0xff] (%p1456_p3)  ;;  %v381_v9 = vld [vmem:[%s329_s23 + $0x28] sm:$0xff] (%p1456_p3)  ;;  %376 = vst [vmem:[%s326_s24] sm:$0xff] (%p1456_p3), %v375_v6  ;;  %378 = vst [vmem:[%s326_s24 + $0x8] sm:$0xff] (%p1456_p3), %v377_v7 }
  0x1d   : > { %v383_v10 = vld [vmem:[%s329_s23 + $0x40] sm:$0xff] (%p1456_p3)  ;;  %v385_v11 = vld [vmem:[%s329_s23 + $0x48] sm:$0xff] (%p1456_p3)  ;;  %380 = vst [vmem:[%s326_s24 + $0x10] sm:$0xff] (%p1456_p3), %v379_v8  ;;  %382 = vst [vmem:[%s326_s24 + $0x18] sm:$0xff] (%p1456_p3), %v381_v9 }
  0x1e   : > { %384 = vst [vmem:[%s326_s24 + $0x20] sm:$0xff] (%p1456_p3), %v383_v10  ;;  %386 = vst [vmem:[%s326_s24 + $0x28] sm:$0xff] (%p1456_p3), %v385_v11  ;;  %v387_v12 = vld [vmem:[%s329_s23 + $0x60] sm:$0xff] (%p1456_p3)  ;;  %v389_v13 = vld [vmem:[%s329_s23 + $0x68] sm:$0xff] (%p1456_p3) }
  0x1f   : > { %v391_v14 = vld [vmem:[%s329_s23 + $0x80] sm:$0xff]  ;;  %388 = vst [vmem:[%s326_s24 + $0x30] sm:$0xff] %v387_v12  ;;  %390 = vst [vmem:[%s326_s24 + $0x38] sm:$0xff] %v389_v13  ;;  %v393_v15 = vld [vmem:[%s329_s23 + $0x88] sm:$0xff] }
  0x20   : > { %392 = vst [vmem:[%s326_s24 + $0x40] sm:$0xff] %v391_v14  ;;  %394 = vst [vmem:[%s326_s24 + $0x48] sm:$0xff] %v393_v15 }
  0x21 PF: > { %p1191_p5 = scmp.ge.s32.totalorder %s1376_s28, 1  ;;  %p399_p6 = scmp.lt.s32.totalorder %s1376_s28, 3 }
  0x23   : > { %p400_p7 = pnand %p1191_p5, %p399_p6 }
  0x24   : > { %v1378_v16 = vmov (!%p400_p7), 0.0   ;;  %v1379_v17 = vmov (!%p400_p7), 0   ;;  %v1348_v18 = vld [vmem:[%s1731_s2] sm:$0xff] (!%p400_p7)   ;;  %s406_s8 = sand.u32 (!%p400_p7), 1, %s1368_s26   ;;  %vm1380_vm0 = vmmov (!%p400_p7), 0   ;;  %vm517_vm1 = vcmask (!%p400_p7), 130048  }
  0x25   : > { %403 = sbr.rel (%p400_p7) target bundleno = 502 (0x1f6), region = 115  ;;  %1235 = vmatprep.subr.bf16.mxu0 (!%p400_p7), %v1378_v16  ;;  %1315 = vset.pattern.permute.xlu1 (!%p400_p7), %v1379_v17  ;;  %v1381_v23 = vmov (!%p400_p7), 1   ;;  %v1382_v26 = vmov (!%p400_p7), 2   ;;  %v1383_v27 = vmov (!%p400_p7), 3   ;;  %v1384_v29 = vmov (!%p400_p7), 4   ;;  %v471_v39 = vld [vmem:[%s1733_s4] sm:$0xff] (!%p400_p7) }
  0x26   : > { %s1281_s10 = smul.u32 (!%p400_p7), 80, %s406_s8  ;;  %1237 = vmatprep.mubr.msk.bf16.mxu0 (!%p400_p7), %vm1380_vm0, %v1378_v16  ;;  %1276 = vmatprep.subr.bf16.mxu1 (!%p400_p7), %v1378_v16  ;;  %v1208_v32 = vld [vmem:[#allocation2] ss:$0 sm:$0xff] (!%p400_p7)  ;;  %v472_v40 = vld [vmem:[%s1733_s4 + $0x8] sm:$0xff] (!%p400_p7)  ;;  %v473_v42 = vld [vmem:[%s1733_s4 + $0x10] sm:$0xff] (!%p400_p7)  ;;  %vm983_vm5 = vcmask (!%p400_p7), 261120  }
  0x27   : > { %1236 = vmatpush3.bf16.msra.mxu0 (!%p400_p7), %v1348_v18  ;;  %s1280_s11 = smul.u32 (!%p400_p7), 40, %s406_s8  ;;  %1277 = vmatpush3.bf16.msra.mxu1 (!%p400_p7), %v1348_v18  ;;  %v1268_v41 = vpack.c.bf16 (!%p400_p7), %v472_v40, %v471_v39  ;;  %v474_v43 = vld [vmem:[%s1733_s4 + $0x18] sm:$0xff] (!%p400_p7)  ;;  %s1192_s23 = sshll.u32 (!%p400_p7), %s1183_s5, 1 }
  0x28   : > { %1249 = vmatprep.mubr.msk.bf16.mxu1 (!%p400_p7), %vm1380_vm0, %v1378_v16  ;;  %1313 = vset.pattern.permute.xlu0 (!%p400_p7), %v1379_v17  ;;  %s1485_s12 = scalar_lea.vmem (!%p400_p7), [#allocation4], %s1281_s10  ;;  %v1272_v44 = vpack.c.bf16 (!%p400_p7), %v474_v43, %v473_v42  ;;  %p456_p8 = scmp.lt.s32.totalorder (!%p400_p7), %s1192_s23, 3 }
  0x29   : > { %v1216_v19 = vld [vmem:[%s1485_s12 + $0x48] sm:$0xff] (!%p400_p7)  ;;  %v1215_v20 = vld [vmem:[%s1485_s12 + $0x40] sm:$0xff] (!%p400_p7)  ;;  %s408_s26 = scalar_lea.vmem (!%p400_p7), [#allocation3], %s1280_s11  ;;  %v1209_v31 = vld [vmem:[%s1485_s12 + $0x10] sm:$0xff] (!%p400_p7)  ;;  %1269 = vmatprep.subr.bf16.mxu1 (!%p400_p7), %v1268_v41 }
  0x2a   : > { %920 = vperm.xlu1 (!%p400_p7), %1315, %v1216_v19   ;;  %v1349_v21 = vld [vmem:[%s408_s26] sm:$0xff] (!%p400_p7)   ;;  %915 = vperm.xlu0 (!%p400_p7), %1313, %v1215_v20   ;;  %v1351_v22 = vld [vmem:[%s408_s26 + $0x18] sm:$0xff] (!%p400_p7)   ;;  %v1350_v24 = vld [vmem:[%s408_s26 + $0x8] sm:$0xff] (!%p400_p7)  }
  0x2b   : > { %1238 = vmatmul.mubr.msk.bf16.vlgmr.msra.gmra.mrb[0].mxu0 (!%p400_p7), %vm517_vm1, %v1349_v21  ;;  %1250 = vmatmul.mubr.msk.bf16.vlgmr.msra.gmra.mrb[0].mxu1 (!%p400_p7), %vm517_vm1, %v1351_v22  ;;  %v1353_v25 = vld [vmem:[%s408_s26 + $0x20] sm:$0xff] (!%p400_p7)   ;;  %v1352_v28 = vld [vmem:[%s408_s26 + $0x10] sm:$0xff] (!%p400_p7)  }
  0x2c   : > { %1241 = vmatprep.mubr.msk.bf16.mxu0 %vm1380_vm0, %v1378_v16  ;;  %1253 = vmatprep.mubr.msk.bf16.mxu1 %vm1380_vm0, %v1378_v16  ;;  %v607_v30 = vld [vmem:[%s1485_s12 + $0x8] sm:$0xff]  ;;  %v606_v33 = vld [vmem:[%s1485_s12] sm:$0xff]  ;;  %v1515_v35 = vld [vmem:[%s1485_s12 + $0x30] sm:$0xff]  ;;  %s1742_s23 = smov (!%p456_p8, %s1192_s23), 3 }
  0x2d   : > { %v1511_v34 = vld [vmem:[%s1485_s12 + $0x28] sm:$0xff]  ;;  %v1210_v36 = vld [vmem:[%s1485_s12 + $0x18] sm:$0xff]  ;;  %v1211_v37 = vld [vmem:[%s1485_s12 + $0x20] sm:$0xff]  ;;  %1271 = vmatpush3.bf16.msra.mxu1 %v1268_v41  ;;  %s1193_s28 = sshll.u32 %s1742_s23, 3 }
  0x2e   : > { %1316 = vset.pattern.permute.xlu1 %v1381_v23  ;;  %1314 = vset.pattern.permute.xlu0 %v1381_v23  ;;  %v1214_v38 = vld [vmem:[%s1485_s12 + $0x38] sm:$0xff]  ;;  %s459_s25 = scalar_lea.vmem %s1735_s6, %s1193_s28  ;;  %s465_s10 = scalar_lea.vmem %s1736_s7, %s1193_s28 }
  0x2f   : > { %930 = vperm.xlu1 %1316, %v1216_v19   ;;  %926 = vperm.xlu0 %1314, %v1215_v20  }
  0x30   : > { %1273 = vmatprep.subr.bf16.mxu1 %v1272_v44 }
  0x31   : > { %1275 = vmatpush3.bf16.msra.mxu1 %v1272_v44 }
  0x33   : > { %1317 = vset.pattern.permute.xlu1 %v1382_v26  ;;  %1242 = vmatmul.mubr.msk.bf16.gmra.mrb[4].mxu0 %vm517_vm1, %v1350_v24 }
  0x34   : > { %938 = vperm.xlu1 %1317, %v1215_v20   ;;  %1245 = vmatprep.mubr.msk.bf16.mxu0 %vm1380_vm0, %v1378_v16 }
  0x35   : > { %1318 = vset.pattern.permute.xlu0 %v1382_v26  ;;  %1254 = vmatmul.mubr.msk.bf16.gmra.mrb[4].mxu1 %vm517_vm1, %v1353_v25 }
  0x36   : > { %942 = vperm.xlu0 %1318, %v1216_v19  }
  0x38   : > { %1319 = vset.pattern.permute.xlu1 %v1383_v27 }
  0x39   : > { %950 = vperm.xlu1 %1319, %v1215_v20  }
  0x3a   : > { %1320 = vset.pattern.permute.xlu0 %v1384_v29 }
  0x3b   : > { %962 = vperm.xlu0 %1320, %v1215_v20   ;;  %1246 = vmatmul.mubr.msk.bf16.gmra.mrb[8].mxu0 %vm517_vm1, %v1352_v28 }
  0x3d   : > { %954 = vperm.xlu1 %1319, %v1216_v19  }
  0x3f   : > { %1324 = vset.pattern.permute.xlu0 %v1381_v23 }
  0x40   : > { %625 = vperm.xlu0 %1324, %v607_v30  }
  0x41   : > { %1321 = vset.pattern.permute.xlu1 %v1384_v29 }
  0x42   : > { %966 = vperm.xlu1 %1321, %v1216_v19  }
  0x44   : > { %707 = vperm.xlu0 %1324, %v1209_v31  }
  0x46   : > { %1322 = vset.pattern.permute.xlu1 %v1379_v17 }
  0x47   : > { %684 = vperm.xlu1 %1322, %v1208_v32  }
  0x48   : > { %1329 = vset.pattern.permute.xlu0 %v1379_v17 }
  0x49   : > { %610 = vperm.xlu0 %1329, %v606_v33  }
  0x4b   : > { %615 = vperm.xlu1 %1322, %v607_v30  }
  0x4d   : > { %774 = vperm.xlu0 %1329, %v1511_v34  }
  0x4f   : > { %1323 = vset.pattern.permute.xlu1 %v1381_v23 }
  0x50   : > { %621 = vperm.xlu1 %1323, %v606_v33  }
  0x51   : > { %842 = vperm.xlu0 %1329, %v1515_v35  }
  0x54   : > { %1325 = vset.pattern.permute.xlu1 %v1382_v26 }
  0x55   : > { %633 = vperm.xlu1 %1325, %v606_v33   ;;  %1336 = vset.pattern.permute.xlu0 %v1382_v26 }
  0x56   : > { %723 = vperm.xlu0 %1336, %v1210_v36  }
  0x59   : > { %637 = vperm.xlu1 %1325, %v607_v30  }
  0x5a   : > { %796 = vperm.xlu0 %1336, %v1511_v34  }
  0x5d   : > { %1326 = vset.pattern.permute.xlu1 %v1383_v27 }
  0x5e   : > { %649 = vperm.xlu1 %1326, %v607_v30   ;;  %1338 = vset.pattern.permute.xlu0 %v1384_v29 }
  0x5f   : > { %661 = vperm.xlu0 %1338, %v607_v30  }
  0x62   : > { %1327 = vset.pattern.permute.xlu1 %v1384_v29 }
  0x63   : > { %657 = vperm.xlu1 %1327, %v606_v33   ;;  %743 = vperm.xlu0 %1338, %v1209_v31  }
  0x67   : > { %1328 = vset.pattern.permute.xlu1 %v1379_v17  ;;  %816 = vperm.xlu0 %1338, %v1211_v37  }
  0x68   : > { %696 = vperm.xlu1 %1328, %v1209_v31  }
  0x6b   : > { %1344 = vset.pattern.permute.xlu0 %v1383_v27 }
  0x6c   : > { %701 = vperm.xlu1 %1328, %v1210_v36   ;;  %645 = vperm.xlu0 %1344, %v606_v33  }
  0x70   : > { %1330 = vset.pattern.permute.xlu1 %v1381_v23  ;;  %804 = vperm.xlu0 %1344, %v1211_v37  }
  0x71   : > { %711 = vperm.xlu1 %1330, %v1210_v36  }
  0x74   : > { %808 = vperm.xlu0 %1344, %v1511_v34  }
  0x75   : > { %1331 = vset.pattern.permute.xlu1 %v1382_v26 }
  0x76   : > { %719 = vperm.xlu1 %1331, %v1209_v31  }
  0x78   : > { %881 = vperm.xlu0 %1344, %v1214_v38  }
  0x7a   : > { %1332 = vset.pattern.permute.xlu1 %v1383_v27 }
  0x7b   : > { %731 = vperm.xlu1 %1332, %v1209_v31  }
  0x7c   : > { %1347 = vset.pattern.permute.xlu0 %v1384_v29 }
  0x7f   : > { %735 = vperm.xlu1 %1332, %v1210_v36  }
  0x83   : > { %1333 = vset.pattern.permute.xlu1 %v1379_v17 }
  0x84   : > { %769 = vperm.xlu1 %1333, %v1211_v37  }
  0x88   : > { %1334 = vset.pattern.permute.xlu1 %v1381_v23 }
  0x89   : > { %780 = vperm.xlu1 %1334, %v1211_v37  }
  0x8d   : > { %784 = vperm.xlu1 %1334, %v1511_v34  }
  0x91   : > { %1335 = vset.pattern.permute.xlu1 %v1382_v26 }
  0x92   : > { %792 = vperm.xlu1 %1335, %v1211_v37  }
  0x96   : > { %1337 = vset.pattern.permute.xlu1 %v1381_v23 }
  0x97   : > { %853 = vperm.xlu1 %1337, %v1515_v35  }
  0x9b   : > { %1339 = vset.pattern.permute.xlu1 %v1379_v17 }
  0x9c   : > { %847 = vperm.xlu1 %1339, %v1214_v38  }
  0xa0   : > { %1340 = vset.pattern.permute.xlu1 %v1381_v23 }
  0xa1   : > { %857 = vperm.xlu1 %1340, %v1214_v38  }
  0xa5   : > { %1341 = vset.pattern.permute.xlu1 %v1382_v26 }
  0xa6   : > { %865 = vperm.xlu1 %1341, %v1515_v35  }
  0xa9   : > { %v1557_v45 = vpop.permute.xlu1 %920  ;;  %v916_v46 = vpop.permute.xlu0 %915 }
  0xaa   : > { %1342 = vset.pattern.permute.xlu1 %v1384_v29 }
  0xab   : > { %747 = vperm.xlu1 %1342, %v1210_v36  }
  0xae   : > { %v1560_v47 = vpop.permute.xlu1 %930  ;;  %v927_v48 = vpop.permute.xlu0 %926 }
  0xaf   : > { %1343 = vset.pattern.permute.xlu1 %v1382_v26 }
  0xb0   : > { %869 = vperm.xlu1 %1343, %v1214_v38  }
  0xb3   : > { %v1563_v49 = vpop.permute.xlu1 %938 }
  0xb4   : > { %1345 = vset.pattern.permute.xlu1 %v1383_v27 }
  0xb5   : > { %877 = vperm.xlu1 %1345, %v1515_v35   ;;  %v1569_v51 = vpop.permute.xlu0 %942 }
  0xb8   : > { %v1567_v50 = vpop.permute.xlu1 %950 }
  0xb9   : > { %1346 = vset.pattern.permute.xlu1 %v1384_v29 }
  0xba   : > { %820 = vperm.xlu1 %1346, %v1511_v34   ;;  %v1574_v53 = vpop.permute.xlu0 %962 }
  0xbc   : > { %v955_v52 = vpop.permute.xlu1 %954 }
  0xbe   : > { %889 = vperm.xlu1 %1346, %v1515_v35  }
  0xbf   : > { %v626_v55 = vpop.permute.xlu0 %625 }
  0xc1   : > { %v1576_v54 = vpop.permute.xlu1 %966 }
  0xc2   : > { %893 = vperm.xlu1 %1346, %v1214_v38  }
  0xc3   : > { %v708_v58 = vpop.permute.xlu0 %707 }
  0xc6   : > { %v1578_v56 = vpop.permute.xlu1 %684 }
  0xc8   : > { %v611_v60 = vpop.permute.xlu0 %610 }
  0xca   : > { %v616_v57 = vpop.permute.xlu1 %615 }
  0xcc   : > { %v775_v62 = vpop.permute.xlu0 %774 }
  0xcf   : > { %v622_v59 = vpop.permute.xlu1 %621 }
  0xd0   : > { %v1584_v0 = vpop.permute.xlu0 %842 }
  0xd4   : > { %v1580_v61 = vpop.permute.xlu1 %633 }
  0xd5   : > { %v1586_v3 = vpop.permute.xlu0 %723 }
  0xd8   : > { %v1582_v63 = vpop.permute.xlu1 %637 }
  0xd9   : > { %v1588_v5 = vpop.permute.xlu0 %796 }
  0xdd   : > { %v650_v1 = vpop.permute.xlu1 %649 }
  0xde   : > { %v1590_v7 = vpop.permute.xlu0 %661 }
  0xe2   : > { %v658_v2 = vpop.permute.xlu1 %657  ;;  %v1592_v9 = vpop.permute.xlu0 %743 }
  0xe6   : > { %v1594_v11 = vpop.permute.xlu0 %816 }
  0xe7   : > { %v697_v4 = vpop.permute.xlu1 %696 }
  0xeb   : > { %v702_v6 = vpop.permute.xlu1 %701  ;;  %v646_v15 = vpop.permute.xlu0 %645 }
  0xef   : > { %v805_v29 = vpop.permute.xlu0 %804 }
  0xf0   : > { %v712_v8 = vpop.permute.xlu1 %711 }
  0xf5   : > { %v720_v10 = vpop.permute.xlu1 %719 }
  0xfa   : > { %v732_v12 = vpop.permute.xlu1 %731 }
  0xfe   : > { %v736_v13 = vpop.permute.xlu1 %735  ;;  %v567_v14 = vpop.f32.mrb[0].mxu0 }
  0xff   : > { %v1239_v16 = vpop.f32.mrb[1].mxu0  ;;  %v1598_v18 = vpop.f32.mrb[0].mxu1  ;;  %v618_v27 = vmul.f32 %v611_v60, %v567_v14  ;;  %v704_v28 = vmul.f32 %v697_v4, %v567_v14  ;;  %v923_v31 = vmul.f32 %v916_v46, %v567_v14 }
 0x100   : > { %v1596_v17 = vpop.f32.mrb[2].mxu0  ;;  %v1251_v21 = vpop.f32.mrb[1].mxu1 }
 0x101   : > { %v619_v19 = vmul.f32 %v616_v57, %v1596_v17  ;;  %v1240_v20 = vpop.f32.mrb[3].mxu0  ;;  %v1601_v23 = vpop.f32.mrb[2].mxu1  ;;  %v924_v37 = vmul.f32 %v1557_v45, %v1596_v17 }
 0x102   : > { %v1604_v24 = vmul.f32 %v650_v1, %v1601_v23  ;;  %v1607_v25 = vmul.f32 %v955_v52, %v1601_v23  ;;  %v1252_v26 = vpop.f32.mrb[3].mxu1  ;;  %v705_v1 = vmul.f32 %v702_v6, %v1596_v17  ;;  %v957_v6 = vmul.f32 %v1567_v50, %v1598_v18 }
 0x103   : > { %v770_v22 = vpop.permute.xlu1 %769  ;;  %v652_v26 = vmul.f32 %v646_v15, %v1598_v18 }
 0x104   : > { %v777_v38 = vmul.f32 %v770_v22, %v567_v14 }
 0x106   : > { %v1609_v30 = vpop.f32.mrb[4].mxu0 }
 0x107   : > { %v628_v32 = vmul.f32 %v622_v59, %v1609_v30  ;;  %v714_v33 = vmul.f32 %v708_v58, %v1609_v30  ;;  %v933_v34 = vmul.f32 %v927_v48, %v1609_v30  ;;  %v1243_v36 = vpop.f32.mrb[5].mxu0 }
 0x108   : > { %v781_v35 = vpop.permute.xlu1 %780  ;;  %v1617_v40 = vpop.f32.mrb[6].mxu0 }
 0x109   : > { %v787_v39 = vmul.f32 %v781_v35, %v1609_v30  ;;  %v1619_v41 = vpop.f32.mrb[4].mxu1  ;;  %v630_v42 = vadd.f32 %v628_v32, %v618_v27  ;;  %v716_v43 = vadd.f32 %v714_v33, %v704_v28  ;;  %v935_v44 = vadd.f32 %v933_v34, %v923_v31  ;;  %v1244_v52 = vpop.f32.mrb[7].mxu0 }
 0x10a   : > { %v629_v46 = vmul.f32 %v626_v55, %v1617_v40  ;;  %v1255_v57 = vpop.f32.mrb[5].mxu1  ;;  %v715_v58 = vmul.f32 %v712_v8, %v1617_v40  ;;  %v934_v45 = vmul.f32 %v1560_v47, %v1617_v40  ;;  %v664_v59 = vmul.f32 %v658_v2, %v1619_v41  ;;  %v809_v28 = vpop.permute.xlu0 %808 }
 0x10b   : > { %v789_v48 = vadd.f32 %v787_v39, %v777_v38  ;;  %v1626_v60 = vpop.f32.mrb[6].mxu1  ;;  %v778_v55 = vmul.f32 %v775_v62, %v1596_v17  ;;  %v738_v47 = vmul.f32 %v732_v12, %v1598_v18  ;;  %v850_v2 = vmul.f32 %v1584_v0, %v567_v14 }
 0x10c   : > { %v631_v4 = vadd.f32 %v629_v46, %v619_v19  ;;  %v785_v16 = vpop.permute.xlu1 %784  ;;  %v1256_v20 = vpop.f32.mrb[7].mxu1  ;;  %v936_v21 = vadd.f32 %v934_v45, %v924_v37  ;;  %v970_v8 = vmul.f32 %v1576_v54, %v1626_v60  ;;  %v717_v27 = vadd.f32 %v715_v58, %v705_v1 }
 0x10d   : > { %v788_v22 = vmul.f32 %v785_v16, %v1617_v40  ;;  %v811_v62 = vmul.f32 %v805_v29, %v1598_v18  ;;  %v739_v32 = vmul.f32 %v736_v13, %v1601_v23  ;;  %v812_v14 = vmul.f32 %v809_v28, %v1601_v23 }
 0x10e   : > { %v1638_v31 = vpop.f32.mrb[8].mxu0  ;;  %v750_v50 = vmul.f32 %v1592_v9, %v1619_v41  ;;  %v969_v33 = vmul.f32 %v1574_v53, %v1619_v41  ;;  %v823_v13 = vmul.f32 %v1594_v11, %v1619_v41 }
 0x10f   : > { %v790_v19 = vadd.f32 %v788_v22, %v778_v55  ;;  %v640_v54 = vmul.f32 %v1580_v61, %v1638_v31  ;;  %v726_v15 = vmul.f32 %v720_v10, %v1638_v31  ;;  %v945_v0 = vmul.f32 %v1563_v49, %v1638_v31  ;;  %v1247_v12 = vpop.f32.mrb[9].mxu0 }
 0x110   : > { %v1654_v34 = vpop.f32.mrb[10].mxu0  ;;  %v665_v61 = vmul.f32 %v1590_v7, %v1626_v60 }
 0x111   : > { %v793_v29 = vpop.permute.xlu1 %792  ;;  %v642_v10 = vadd.f32 %v640_v54, %v630_v42  ;;  %v728_v49 = vadd.f32 %v726_v15, %v716_v43  ;;  %v947_v35 = vadd.f32 %v945_v0, %v935_v44  ;;  %v1248_v37 = vpop.f32.mrb[11].mxu0  ;;  %v641_v9 = vmul.f32 %v1582_v63, %v1654_v34  ;;  %v1670_v44 = vld [vmem:[%s1732_s3] ss:$0 sm:$0xff] }
 0x112   : > { %v799_v36 = vmul.f32 %v793_v29, %v1638_v31  ;;  %v946_v53 = vmul.f32 %v1569_v51, %v1654_v34  ;;  %v727_v11 = vmul.f32 %v1586_v3, %v1654_v34  ;;  %v800_v38 = vmul.f32 %v1588_v5, %v1654_v34 }
 0x113   : > { %v654_v39 = vadd.f32 %v652_v26, %v642_v10  ;;  %v740_v7 = vadd.f32 %v738_v47, %v728_v49  ;;  %v959_v43 = vadd.f32 %v957_v6, %v947_v35  ;;  %v643_v46 = vadd.f32 %v641_v9, %v631_v4 }
 0x114   : > { %v801_v42 = vadd.f32 %v799_v36, %v789_v48  ;;  %v948_v63 = vadd.f32 %v946_v53, %v936_v21  ;;  %v729_v52 = vadd.f32 %v727_v11, %v717_v27  ;;  %v802_v57 = vadd.f32 %v800_v38, %v790_v19  ;;  %v882_v53 = vpop.permute.xlu0 %881 }
 0x115   : > { %v666_v51 = vadd.f32 %v664_v59, %v654_v39  ;;  %v752_v58 = vadd.f32 %v750_v50, %v740_v7  ;;  %v971_v1 = vadd.f32 %v969_v33, %v959_v43  ;;  %v655_v5 = vadd.f32 %v1604_v24, %v643_v46 }
 0x116   : > { %v813_v45 = vadd.f32 %v811_v62, %v801_v42  ;;  %v854_v3 = vpop.permute.xlu1 %853  ;;  %v960_v16 = vadd.f32 %v1607_v25, %v948_v63  ;;  %v741_v20 = vadd.f32 %v739_v32, %v729_v52  ;;  %v814_v27 = vadd.f32 %v812_v14, %v802_v57 }
 0x117   : > { %v860_v48 = vmul.f32 %v854_v3, %v1609_v30  ;;  %v674_v55 = vadd.f32 %v1670_v44, %v666_v51  ;;  %v754_v22 = vadd.f32 %v1670_v44, %v752_v58  ;;  %v973_v21 = vadd.f32 %v1670_v44, %v971_v1 }
 0x118   : > { %v825_v4 = vadd.f32 %v823_v13, %v813_v45  ;;  %v667_v26 = vadd.f32 %v665_v61, %v655_v5  ;;  %v972_v59 = vadd.f32 %v970_v8, %v960_v16 }
 0x119   : > { %v862_v47 = vadd.f32 %v860_v48, %v850_v2  ;;  %vm676_vm2 = vcmp.gt.f32.partialorder %v674_v55, 0.0  ;;  %v687_v28 = vmul.f32 %v1578_v56, %v674_v55  ;;  %vm756_vm3 = vcmp.gt.f32.partialorder %v754_v22, 0.0 }
 0x11a   : > { %v758_v24 = vmul.f32 %v754_v22, %v1578_v56  ;;  %v827_v25 = vadd.f32 %v1670_v44, %v825_v4  ;;  %v974_v30 = vadd.f32 %v1670_v44, %v972_v59  ;;  %vm975_vm4 = vcmp.gt.f32.partialorder %v973_v21, 0.0 }
 0x11b   : > { %v848_v6 = vpop.permute.xlu1 %847  ;;  %v977_v19 = vmul.f32 %v973_v21, %v1578_v56  ;;  %v689_v62 = vsel %vm676_vm2, %v674_v55, %v687_v28  ;;  %v675_v36 = vadd.f32 %v1670_v44, %v667_v26 }
 0x11c   : > { %v760_v32 = vsel %vm756_vm3, %v754_v22, %v758_v24  ;;  %vm829_vm6 = vcmp.gt.f32.partialorder %v827_v25, 0.0  ;;  %v831_v8 = vmul.f32 %v827_v25, %v1578_v56  ;;  %vm976_vm7 = vcmp.gt.f32.partialorder %v974_v30, 0.0 }
 0x11d   : > { %v978_v2 = vmul.f32 %v974_v30, %v1578_v56  ;;  %v979_v54 = vsel %vm975_vm4, %v973_v21, %v977_v19  ;;  %v762_v15 = vadd.f32 %v760_v32, %v689_v62  ;;  %v851_v33 = vmul.f32 %v848_v6, %v1596_v17 }
 0x11e   : > { %1265 = vmatprep.mubr.msk.f32.mxu1 %vm983_vm5, %v979_v54  ;;  %v833_v12 = vsel %vm829_vm6, %v827_v25, %v831_v8  ;;  %v688_v11 = vmul.f32 %v1578_v56, %v675_v36  ;;  %vm677_vm8 = vcmp.gt.f32.partialorder %v675_v36, 0.0 }
 0x11f   : > { %v980_v0 = vsel %vm976_vm7, %v974_v30, %v978_v2  ;;  %v835_v50 = vadd.f32 %v833_v12, %v762_v15 }
 0x120   : > { %1266 = vmatmul.mubr.msk.f32.vlgmr.msra.gmra.mrb[8].mxu1 %vm983_vm5, %v980_v0  ;;  %v858_v14 = vpop.permute.xlu1 %857  ;;  %v690_v42 = vsel %vm677_vm8, %v675_v36, %v688_v11 }
 0x121   : > { %v861_v29 = vmul.f32 %v858_v14, %v1617_v40 }
 0x123   : > { %v863_v13 = vadd.f32 %v861_v29, %v851_v33 }
 0x125   : > { %v866_v61 = vpop.permute.xlu1 %865 }
 0x126   : > { %v872_v10 = vmul.f32 %v866_v61, %v1638_v31  ;;  %v885_v31 = vmul.f32 %v882_v53, %v1601_v23 }
 0x128   : > { %v874_v49 = vadd.f32 %v872_v10, %v862_v47 }
 0x12a   : > { %v748_v35 = vpop.permute.xlu1 %747 }
 0x12b   : > { %v751_v37 = vmul.f32 %v748_v35, %v1626_v60 }
 0x12d   : > { %v753_v9 = vadd.f32 %v751_v37, %v741_v20 }
 0x12f   : > { %v755_v38 = vadd.f32 %v1670_v44, %v753_v9  ;;  %v870_v39 = vpop.permute.xlu1 %869 }
 0x130   : > { %v873_v17 = vmul.f32 %v870_v39, %v1654_v34 }
 0x131   : > { %vm757_vm9 = vcmp.gt.f32.partialorder %v755_v38, 0.0  ;;  %v759_v40 = vmul.f32 %v755_v38, %v1578_v56 }
 0x132   : > { %v875_v7 = vadd.f32 %v873_v17, %v863_v13 }
 0x133   : > { %v761_v43 = vsel %vm757_vm9, %v755_v38, %v759_v40 }
 0x134   : > { %v763_v46 = vadd.f32 %v761_v43, %v690_v42  ;;  %v878_v63 = vpop.permute.xlu1 %877  ;;  %v887_v52 = vadd.f32 %v885_v31, %v875_v7 }
 0x135   : > { %v884_v57 = vmul.f32 %v878_v63, %v1598_v18 }
 0x137   : > { %v886_v51 = vadd.f32 %v884_v57, %v874_v49 }
 0x139   : > { %v821_v58 = vpop.permute.xlu1 %820 }
 0x13a   : > { %v824_v45 = vmul.f32 %v821_v58, %v1626_v60 }
 0x13c   : > { %v826_v34 = vadd.f32 %v824_v45, %v814_v27 }
 0x13d   : > { %v890_v3 = vpop.permute.xlu1 %889 }
 0x13e   : > { %v828_v1 = vadd.f32 %v1670_v44, %v826_v34  ;;  %v896_v23 = vmul.f32 %v890_v3, %v1619_v41 }
 0x140   : > { %vm830_vm10 = vcmp.gt.f32.partialorder %v828_v1, 0.0  ;;  %v832_v5 = vmul.f32 %v828_v1, %v1578_v56  ;;  %v898_v16 = vadd.f32 %v896_v23, %v886_v51 }
 0x141   : > { %v894_v48 = vpop.permute.xlu1 %893 }
 0x142   : > { %v834_v18 = vsel %vm830_vm10, %v828_v1, %v832_v5  ;;  %v900_v20 = vadd.f32 %v1670_v44, %v898_v16  ;;  %v897_v55 = vmul.f32 %v894_v48, %v1626_v60 }
 0x143   : > { %v836_v22 = vadd.f32 %v834_v18, %v763_v46 }
 0x144   : > { %vm902_vm11 = vcmp.gt.f32.partialorder %v900_v20, 0.0  ;;  %v904_v4 = vmul.f32 %v900_v20, %v1578_v56  ;;  %v899_v21 = vadd.f32 %v897_v55, %v887_v52 }
 0x146   : > { %v906_v26 = vsel %vm902_vm11, %v900_v20, %v904_v4  ;;  %v901_v41 = vadd.f32 %v1670_v44, %v899_v21 }
 0x147   : > { %v908_v59 = vadd.f32 %v906_v26, %v835_v50 }
 0x148   : > { %vm903_vm12 = vcmp.gt.f32.partialorder %v901_v41, 0.0  ;;  %v905_v47 = vmul.f32 %v901_v41, %v1578_v56 }
 0x149   : > { %v981_v27 = vmul.f32 0.25, %v908_v59 }
 0x14a   : > { %v907_v28 = vsel %vm903_vm12, %v901_v41, %v905_v47 }
 0x14b   : > { %v909_v60 = vadd.f32 %v907_v28, %v836_v22  ;;  %984 = vst.msk [vmem:[%s459_s25] sm:$0xff] %vm983_vm5, %v981_v27 }
 0x14d   : > { %v982_v24 = vmul.f32 0.25, %v909_v60 }
 0x14f   : > { %985 = vst.msk [vmem:[%s459_s25 + $0x8] sm:$0xff] %vm983_vm5, %v982_v24 }
 0x1f3   : > { %v1267_v44 = vpop.f32.mrb[8].mxu1 }
 0x1f4   : > { %v1058_v25 = vpop.f32.mrb[9].mxu1  ;;  %1068 = vst.msk [vmem:[%s465_s10 + $0x8] sm:$0xff] %vm983_vm5, %v1267_v44 }
 0x1f5   : > { %1067 = vst.msk [vmem:[%s465_s10] sm:$0xff] %vm983_vm5, %v1058_v25 }
 0x1f6 PF: > { %p17_p9 = scmp.ge.s32.totalorder %s1445_s29, 4   ;;  %s1738_s26 = smov %s1372_s27 }
 0x1f7   : > { %s1739_s27 = smov %s1454_s9  ;;  %s1740_s28 = smov %s1445_s29 }
 0x1f8   :  { %19 = sbr.rel (!%p17_p9) target bundleno = 5 (0x5), region = 182 }

</bundles_post_ra>
